<compile_context>
chip_gen: v6e
topology: v6e:2x2x1
jax: 0.10.0
libtpu: 0.0.40
codegen_flags: <defaults>
</compile_context>

<pallas_src>
import jax
import jax.numpy as jnp
from jax.experimental import pallas as pl
from jax.experimental.pallas import tpu as pltpu


def _pitch_head_kernel(x_ref, w_ref, b_ref, o_ref):
    # x_ref: (T, C)   input, channels-last (C on lanes)
    # w_ref: (3, C, O) conv taps, w_ref[k][c, o] = torch_w[o, c, k]
    # b_ref: (1, O)   bias
    # o_ref: (T, O)   log-softmax(CELU(conv)) output
    x = x_ref[...]
    c = x.shape[1]
    zero_row = jnp.zeros((1, c), dtype=x.dtype)
    # time shifts for the k=3, padding=1 conv (zero padded at the edges)
    x_prev = jnp.concatenate([zero_row, x[:-1, :]], axis=0)   # x[t-1]
    x_next = jnp.concatenate([x[1:, :], zero_row], axis=0)    # x[t+1]

    # Conv1d(k=3, pad=1) as three MXU matmuls with f32 accumulation.
    y = jnp.dot(x_prev, w_ref[0], preferred_element_type=jnp.float32)
    y += jnp.dot(x, w_ref[1], preferred_element_type=jnp.float32)
    y += jnp.dot(x_next, w_ref[2], preferred_element_type=jnp.float32)
    y += b_ref[...]

    # CELU(alpha=1): max(0, y) + (exp(min(0, y)) - 1)   (overflow-safe)
    y = jnp.maximum(y, 0.0) + (jnp.exp(jnp.minimum(y, 0.0)) - 1.0)

    # LogSoftmax over the channel axis (lanes).
    m = jnp.max(y, axis=-1, keepdims=True)
    lse = m + jnp.log(jnp.sum(jnp.exp(y - m), axis=-1, keepdims=True))
    o_ref[...] = (y - lse).astype(o_ref.dtype)


@jax.jit
def head_forward(x, w_pitch, b_pitch):
    """JAX/Pallas equivalent of Head.forward (all optional heads disabled).

    x:       (N, C, T, 1)  float32
    w_pitch: (128, C, 3)   Conv1d weight, PyTorch layout (O, I, K)
    b_pitch: (128,)        Conv1d bias
    returns: (N, T, 4 + 128)
    """
    n, c, t = x.shape[0], x.shape[1], x.shape[2]
    out_ch = w_pitch.shape[0]

    x3 = x.reshape(n, c, t)                    # drop trailing singleton
    x_ntc = jnp.transpose(x3, (0, 2, 1))       # (N, T, C)  -> lane-dense C
    w_taps = jnp.transpose(w_pitch, (2, 1, 0)) # (3, C, O): w_taps[k, c, o]
    b2 = b_pitch.reshape(1, out_ch)

    pitch = pl.pallas_call(
        _pitch_head_kernel,
        out_shape=jax.ShapeDtypeStruct((n, t, out_ch), x.dtype),
        grid_spec=pltpu.PrefetchScalarGridSpec(
            num_scalar_prefetch=0,
            grid=(n,),
            in_specs=[
                pl.BlockSpec((pl.Squeezed(), t, c), lambda i: (i, 0, 0)),
                pl.BlockSpec((3, c, out_ch), lambda i: (0, 0, 0)),
                pl.BlockSpec((1, out_ch), lambda i: (0, 0)),
            ],
            out_specs=pl.BlockSpec((pl.Squeezed(), t, out_ch),
                                   lambda i: (i, 0, 0)),
        ),
        compiler_params=pltpu.CompilerParams(
            dimension_semantics=("parallel",)),
    )(x_ntc, w_taps, b2)

    # width / offset / confidence / presence heads are disabled in the module:
    # forward emits exact zeros for those four channels.
    zeros4 = jnp.zeros((n, t, 4), dtype=pitch.dtype)
    return jnp.concatenate([zeros4, pitch], axis=-1)   # (N, T, 132)


def head_reference(x, w_pitch, b_pitch):
    """Pure-JAX reference of the same forward pass (for correctness check)."""
    n, c, t = x.shape[0], x.shape[1], x.shape[2]
    x3 = x.reshape(n, c, t)
    xp = jnp.pad(x3, ((0, 0), (0, 0), (1, 1)))
    windows = jnp.stack([xp[:, :, k:k + t] for k in range(3)], axis=-1)  # (n,c,t,3)
    y = jnp.einsum('nctk,ock->not', windows, w_pitch,
                   precision=jax.lax.Precision.HIGHEST)
    y = y + b_pitch[None, :, None]
    y = jnp.maximum(y, 0.0) + (jnp.exp(jnp.minimum(y, 0.0)) - 1.0)  # CELU
    y = y - jax.scipy.special.logsumexp(y, axis=1, keepdims=True)   # LogSoftmax
    zeros = jnp.zeros((n, 4, t), dtype=y.dtype)
    return jnp.transpose(jnp.concatenate([zeros, y], axis=1), (0, 2, 1))


if __name__ == "__main__":
    key = jax.random.PRNGKey(0)
    k1, k2, k3 = jax.random.split(key, 3)

    width = 4                    # Head(width=4) default
    c_in = 256 // 4 * width      # 256
    out_ch = 128
    n, t = 2, 16

    x = jax.random.normal(k1, (n, c_in, t, 1), dtype=jnp.float32)
    w_pitch = jax.random.normal(k2, (out_ch, c_in, 3), dtype=jnp.float32) * 0.05
    b_pitch = jax.random.normal(k3, (out_ch,), dtype=jnp.float32) * 0.1

    out = head_forward(x, w_pitch, b_pitch)
    jax.block_until_ready(out)

    ref = head_reference(x, w_pitch, b_pitch)
    assert out.shape == (n, t, 4 + out_ch), out.shape
    assert out.dtype == x.dtype
    max_diff = float(jnp.max(jnp.abs(out - ref)))
    assert jnp.allclose(out, ref, atol=1e-2, rtol=1e-2), (
        f"mismatch vs reference, max abs diff = {max_diff}")

    print("KERNEL_OK")
</pallas_src>

<mosaic_0001>
module attributes {stable_mosaic.version = 11 : i64} {
  func.func @_pitch_head_kernel(%arg0: i32, %arg1: memref<1x16x256xf32, #tpu.memory_space<vmem>>, %arg2: memref<3x256x128xf32, #tpu.memory_space<vmem>>, %arg3: memref<1x128xf32, #tpu.memory_space<vmem>>, %arg4: memref<1x16x128xf32, #tpu.memory_space<vmem>>) attributes {dimension_semantics = [#tpu.dimension_semantics<parallel>], iteration_bounds = array<i64: 2>, scalar_prefetch = 0 : i64, scratch_operands = 0 : i64, tpu.core_type = #tpu.core_type<tc>, window_params = [{transform_indices = @transform_0, window_bounds = array<i64: 1, 16, 256>}, {pipeline_mode = #tpu.pipeline_mode<synchronous>, transform_indices = @transform_1, window_bounds = array<i64: 3, 256, 128>}, {pipeline_mode = #tpu.pipeline_mode<synchronous>, transform_indices = @transform_2, window_bounds = array<i64: 1, 128>}, {transform_indices = @transform_3, window_bounds = array<i64: 1, 16, 128>}]} {
    %c0 = arith.constant 0 : index
    %c0_0 = arith.constant 0 : index
    %c0_1 = arith.constant 0 : index
    %0 = vector.load %arg1[%c0, %c0_0, %c0_1] : memref<1x16x256xf32, #tpu.memory_space<vmem>>, vector<1x16x256xf32>
    %1 = vector.shape_cast %0 : vector<1x16x256xf32> to vector<16x256xf32>
    %cst = arith.constant 0.000000e+00 : f32
    %2 = vector.broadcast %cst : f32 to vector<1x256xf32>
    %3 = vector.extract_strided_slice %1 {offsets = [0, 0], sizes = [15, 256], strides = [1, 1]} : vector<16x256xf32> to vector<15x256xf32>
    %4 = tpu.concatenate %2, %3 in 0 : vector<1x256xf32>, vector<15x256xf32> -> vector<16x256xf32>
    %5 = vector.extract_strided_slice %1 {offsets = [1, 0], sizes = [15, 256], strides = [1, 1]} : vector<16x256xf32> to vector<15x256xf32>
    %6 = tpu.concatenate %5, %2 in 0 : vector<15x256xf32>, vector<1x256xf32> -> vector<16x256xf32>
    %c0_2 = arith.constant 0 : index
    %c0_3 = arith.constant 0 : index
    %c0_4 = arith.constant 0 : index
    %7 = vector.load %arg2[%c0_2, %c0_3, %c0_4] : memref<3x256x128xf32, #tpu.memory_space<vmem>>, vector<1x256x128xf32>
    %8 = vector.shape_cast %7 : vector<1x256x128xf32> to vector<256x128xf32>
    %cst_5 = arith.constant dense<0.000000e+00> : vector<16x128xf32>
    %9 = tpu.matmul %4, %8, %cst_5 {dimension_numbers = #tpu.dot_dimension_numbers<[1], [0], [0], [1], [0, 0, 1, 1], [], []>} : vector<16x256xf32>, vector<256x128xf32>, vector<16x128xf32> -> vector<16x128xf32>
    %c1 = arith.constant 1 : index
    %c0_6 = arith.constant 0 : index
    %c0_7 = arith.constant 0 : index
    %10 = vector.load %arg2[%c1, %c0_6, %c0_7] : memref<3x256x128xf32, #tpu.memory_space<vmem>>, vector<1x256x128xf32>
    %11 = vector.shape_cast %10 : vector<1x256x128xf32> to vector<256x128xf32>
    %cst_8 = arith.constant dense<0.000000e+00> : vector<16x128xf32>
    %12 = tpu.matmul %1, %11, %cst_8 {dimension_numbers = #tpu.dot_dimension_numbers<[1], [0], [0], [1], [0, 0, 1, 1], [], []>} : vector<16x256xf32>, vector<256x128xf32>, vector<16x128xf32> -> vector<16x128xf32>
    %13 = arith.addf %9, %12 : vector<16x128xf32>
    %c2 = arith.constant 2 : index
    %c0_9 = arith.constant 0 : index
    %c0_10 = arith.constant 0 : index
    %14 = vector.load %arg2[%c2, %c0_9, %c0_10] : memref<3x256x128xf32, #tpu.memory_space<vmem>>, vector<1x256x128xf32>
    %15 = vector.shape_cast %14 : vector<1x256x128xf32> to vector<256x128xf32>
    %cst_11 = arith.constant dense<0.000000e+00> : vector<16x128xf32>
    %16 = tpu.matmul %6, %15, %cst_11 {dimension_numbers = #tpu.dot_dimension_numbers<[1], [0], [0], [1], [0, 0, 1, 1], [], []>} : vector<16x256xf32>, vector<256x128xf32>, vector<16x128xf32> -> vector<16x128xf32>
    %17 = arith.addf %13, %16 : vector<16x128xf32>
    %c0_12 = arith.constant 0 : index
    %c0_13 = arith.constant 0 : index
    %18 = vector.load %arg3[%c0_12, %c0_13] : memref<1x128xf32, #tpu.memory_space<vmem>>, vector<1x128xf32>
    %19 = vector.broadcast %18 : vector<1x128xf32> to vector<16x128xf32>
    %20 = arith.addf %17, %19 : vector<16x128xf32>
    %cst_14 = arith.constant 0.000000e+00 : f32
    %21 = vector.broadcast %cst_14 : f32 to vector<16x128xf32>
    %22 = arith.maximumf %20, %21 : vector<16x128xf32>
    %cst_15 = arith.constant 0.000000e+00 : f32
    %23 = vector.broadcast %cst_15 : f32 to vector<16x128xf32>
    %24 = arith.minimumf %20, %23 : vector<16x128xf32>
    %25 = math.exp %24 : vector<16x128xf32>
    %cst_16 = arith.constant 1.000000e+00 : f32
    %26 = vector.broadcast %cst_16 : f32 to vector<16x128xf32>
    %27 = arith.subf %25, %26 : vector<16x128xf32>
    %28 = arith.addf %22, %27 : vector<16x128xf32>
    %cst_17 = arith.constant dense<0xFF800000> : vector<16xf32>
    %29 = vector.multi_reduction <maximumf>, %28, %cst_17 [1] : vector<16x128xf32> to vector<16xf32>
    %30 = vector.shape_cast %29 : vector<16xf32> to vector<16x1xf32>
    %31 = vector.broadcast %30 : vector<16x1xf32> to vector<16x128xf32>
    %32 = arith.subf %28, %31 : vector<16x128xf32>
    %33 = math.exp %32 : vector<16x128xf32>
    %cst_18 = arith.constant dense<0.000000e+00> : vector<16xf32>
    %34 = vector.multi_reduction <add>, %33, %cst_18 [1] : vector<16x128xf32> to vector<16xf32>
    %35 = vector.shape_cast %34 : vector<16xf32> to vector<16x1xf32>
    %36 = math.log %35 : vector<16x1xf32>
    %37 = arith.addf %30, %36 : vector<16x1xf32>
    %38 = vector.broadcast %37 : vector<16x1xf32> to vector<16x128xf32>
    %39 = arith.subf %28, %38 : vector<16x128xf32>
    %c0_19 = arith.constant 0 : index
    %c0_20 = arith.constant 0 : index
    %c0_21 = arith.constant 0 : index
    %40 = vector.load %arg4[%c0_19, %c0_20, %c0_21] : memref<1x16x128xf32, #tpu.memory_space<vmem>>, vector<1x16x128xf32>
    %41 = vector.shape_cast %40 : vector<1x16x128xf32> to vector<16x128xf32>
    %42 = vector.shape_cast %39 : vector<16x128xf32> to vector<1x16x128xf32>
    tpu.vector_store %arg4[%c0_19, %c0_20, %c0_21], %42 {strides = array<i32>} : memref<1x16x128xf32, #tpu.memory_space<vmem>>, vector<1x16x128xf32>,
    return
  }
  func.func @transform_0(%arg0: i32) -> (i32, i32, i32) {
    %c0_i32 = arith.constant 0 : i32
    %c0_i32_0 = arith.constant 0 : i32
    %c0_i32_1 = arith.constant 0 : i32
    return %arg0, %c0_i32, %c0_i32_0 : i32, i32, i32
  }
  func.func @transform_1(%arg0: i32) -> (i32, i32, i32) {
    %c0_i32 = arith.constant 0 : i32
    %c0_i32_0 = arith.constant 0 : i32
    %c0_i32_1 = arith.constant 0 : i32
    %c0_i32_2 = arith.constant 0 : i32
    return %c0_i32, %c0_i32_0, %c0_i32_1 : i32, i32, i32
  }
  func.func @transform_2(%arg0: i32) -> (i32, i32) {
    %c0_i32 = arith.constant 0 : i32
    %c0_i32_0 = arith.constant 0 : i32
    %c0_i32_1 = arith.constant 0 : i32
    return %c0_i32, %c0_i32_0 : i32, i32
  }
  func.func @transform_3(%arg0: i32) -> (i32, i32, i32) {
    %c0_i32 = arith.constant 0 : i32
    %c0_i32_0 = arith.constant 0 : i32
    %c0_i32_1 = arith.constant 0 : i32
    return %arg0, %c0_i32, %c0_i32_0 : i32, i32, i32
  }
}

</mosaic_0001>

<bundles_post_ra>
// kernel: head_forward.1
= control target key start
LH: loop header
LB: loop body
LE: loop exit
PB: predicated region body
PF: predicated region fallthrough
CT: control target
= control target key end

     0   :  { %s910_s12 = smov 0   ;;  %s1268_s0 = inlined_call_operand.vmem [shape: f32[2,16,256], index: 0, kind: input, shape index: {}]   ;;  %s1269_s1 = inlined_call_operand.vmem [shape: f32[3,256,128], index: 1, kind: input, shape index: {}]   ;;  %s1270_s2 = inlined_call_operand.vmem [shape: f32[1,128], index: 2, kind: input, shape index: {}]   ;;  %s1271_s3 = inlined_call_operand.vmem [shape: f32[2,16,128], index: 3, kind: output, shape index: {}]  }
   0x1 LB: > { %s630_s13 = sadd.s32 4294967295, %s888_s12   ;;  %p634_p0 = scmp.ge.s32.totalorder %s888_s12, 1  ;;  %s888_s12 = sphi %s910_s12, %s13_s12  }
   0x2   : > { %p137_p1 = scmp.lt.s32.totalorder %s888_s12, 3 }
   0x4   : > { %p138_p2 = pnand %p634_p0, %p137_p1 }
   0x5   : > { %p1010_p3 = scmp.lt.s32.totalorder (!%p138_p2), %s630_s13, 1 }
   0x6   : > { %141 = sbr.rel (%p138_p2) target bundleno = 624 (0x270), region = 32 }
   0xb   : > { %v670_v0 = vld [vmem:[%s1269_s1 + $0x1f8] sm:$0xff]  ;;  %v669_v4 = vld [vmem:[%s1269_s1 + $0x1f0] sm:$0xff]  ;;  %v668_v8 = vld [vmem:[%s1269_s1 + $0x1e8] sm:$0xff]  ;;  %s1274_s13 = smov (!%p1010_p3, %s630_s13), 1  ;;  %vm179_vm0 = vcmask 1040384   ;;  %vm192_vm2 = vcmask 1046528  }
   0xc   : > { %v236_v1 = vld [vmem:[%s1269_s1 + $0xf8] sm:$0xff]  ;;  %716 = vmatprep.subr.mxu0 %v670_v0  ;;  %v235_v5 = vld [vmem:[%s1269_s1 + $0xf0] sm:$0xff]  ;;  %v234_v9 = vld [vmem:[%s1269_s1 + $0xe8] sm:$0xff]  ;;  %s714_s5 = sshll.u32 %s1274_s13, 5  ;;  %s715_s15 = sshll.u32 %s1274_s13, 4 }
   0xd   : > { %v654_v2 = vld [vmem:[%s1269_s1 + $0x178] sm:$0xff]  ;;  %754 = vmatprep.subr.mxu1 %v236_v1  ;;  %v653_v6 = vld [vmem:[%s1269_s1 + $0x170] sm:$0xff]  ;;  %v652_v10 = vld [vmem:[%s1269_s1 + $0x168] sm:$0xff]  ;;  %s1090_s22 = scalar_lea.vmem %s1268_s0, %s714_s5  ;;  %s170_s18 = scalar_lea.vmem %s1271_s3, %s715_s15 }
   0xe   : > { %v220_v3 = vld [vmem:[%s1269_s1 + $0x78] sm:$0xff]  ;;  %717 = vmatpush3.msra.mxu0 %v654_v2  ;;  %v219_v7 = vld [vmem:[%s1269_s1 + $0x70] sm:$0xff]  ;;  %v218_v11 = vld [vmem:[%s1269_s1 + $0x68] sm:$0xff] }
   0xf   : > { %755 = vmatpush3.msra.mxu1 %v220_v3  ;;  %718 = vmatprep.subr.mxu0 %v669_v4  ;;  %v667_v12 = vld [vmem:[%s1269_s1 + $0x1e0] sm:$0xff]  ;;  %v666_v16 = vld [vmem:[%s1269_s1 + $0x1d8] sm:$0xff]  ;;  %v665_v20 = vld [vmem:[%s1269_s1 + $0x1d0] sm:$0xff] }
  0x10   : > { %756 = vmatprep.subr.mxu1 %v235_v5  ;;  %719 = vmatpush3.msra.mxu0 %v653_v6  ;;  %v233_v13 = vld [vmem:[%s1269_s1 + $0xe0] sm:$0xff]  ;;  %v232_v17 = vld [vmem:[%s1269_s1 + $0xd8] sm:$0xff]  ;;  %v231_v21 = vld [vmem:[%s1269_s1 + $0xd0] sm:$0xff] }
  0x11   : > { %757 = vmatpush3.msra.mxu1 %v219_v7  ;;  %720 = vmatprep.subr.mxu0 %v668_v8  ;;  %v651_v14 = vld [vmem:[%s1269_s1 + $0x160] sm:$0xff]  ;;  %v650_v18 = vld [vmem:[%s1269_s1 + $0x158] sm:$0xff]  ;;  %v649_v22 = vld [vmem:[%s1269_s1 + $0x150] sm:$0xff] }
  0x12   : > { %758 = vmatprep.subr.mxu1 %v234_v9  ;;  %v217_v15 = vld [vmem:[%s1269_s1 + $0x60] sm:$0xff]  ;;  %721 = vmatpush3.msra.mxu0 %v652_v10  ;;  %v216_v19 = vld [vmem:[%s1269_s1 + $0x58] sm:$0xff]  ;;  %v215_v23 = vld [vmem:[%s1269_s1 + $0x50] sm:$0xff] }
  0x13   : > { %759 = vmatpush3.msra.mxu1 %v218_v11  ;;  %722 = vmatprep.subr.mxu0 %v667_v12  ;;  %v664_v24 = vld [vmem:[%s1269_s1 + $0x1c8] sm:$0xff]  ;;  %v663_v28 = vld [vmem:[%s1269_s1 + $0x1c0] sm:$0xff]  ;;  %v662_v32 = vld [vmem:[%s1269_s1 + $0x1b8] sm:$0xff] }
  0x14   : > { %760 = vmatprep.subr.mxu1 %v233_v13  ;;  %723 = vmatpush3.msra.mxu0 %v651_v14  ;;  %v230_v25 = vld [vmem:[%s1269_s1 + $0xc8] sm:$0xff]  ;;  %v229_v29 = vld [vmem:[%s1269_s1 + $0xc0] sm:$0xff]  ;;  %v228_v33 = vld [vmem:[%s1269_s1 + $0xb8] sm:$0xff] }
  0x15   : > { %761 = vmatpush3.msra.mxu1 %v217_v15  ;;  %724 = vmatprep.subr.mxu0 %v666_v16  ;;  %v648_v26 = vld [vmem:[%s1269_s1 + $0x148] sm:$0xff]  ;;  %v647_v30 = vld [vmem:[%s1269_s1 + $0x140] sm:$0xff]  ;;  %v646_v34 = vld [vmem:[%s1269_s1 + $0x138] sm:$0xff] }
  0x16   : > { %762 = vmatprep.subr.mxu1 %v232_v17  ;;  %725 = vmatpush3.msra.mxu0 %v650_v18  ;;  %v214_v27 = vld [vmem:[%s1269_s1 + $0x48] sm:$0xff]  ;;  %v213_v31 = vld [vmem:[%s1269_s1 + $0x40] sm:$0xff]  ;;  %v212_v35 = vld [vmem:[%s1269_s1 + $0x38] sm:$0xff] }
  0x17   : > { %763 = vmatpush3.msra.mxu1 %v216_v19  ;;  %726 = vmatprep.subr.mxu0 %v665_v20  ;;  %v661_v36 = vld [vmem:[%s1269_s1 + $0x1b0] sm:$0xff]  ;;  %v660_v40 = vld [vmem:[%s1269_s1 + $0x1a8] sm:$0xff]  ;;  %v659_v44 = vld [vmem:[%s1269_s1 + $0x1a0] sm:$0xff] }
  0x18   : > { %764 = vmatprep.subr.mxu1 %v231_v21  ;;  %727 = vmatpush3.msra.mxu0 %v649_v22  ;;  %v227_v37 = vld [vmem:[%s1269_s1 + $0xb0] sm:$0xff]  ;;  %v226_v41 = vld [vmem:[%s1269_s1 + $0xa8] sm:$0xff]  ;;  %v225_v45 = vld [vmem:[%s1269_s1 + $0xa0] sm:$0xff] }
  0x19   : > { %765 = vmatpush3.msra.mxu1 %v215_v23  ;;  %728 = vmatprep.subr.mxu0 %v664_v24  ;;  %v645_v38 = vld [vmem:[%s1269_s1 + $0x130] sm:$0xff]  ;;  %v644_v42 = vld [vmem:[%s1269_s1 + $0x128] sm:$0xff]  ;;  %v643_v46 = vld [vmem:[%s1269_s1 + $0x120] sm:$0xff] }
  0x1a   : > { %766 = vmatprep.subr.mxu1 %v230_v25  ;;  %729 = vmatpush3.msra.mxu0 %v648_v26  ;;  %v211_v39 = vld [vmem:[%s1269_s1 + $0x30] sm:$0xff]  ;;  %v210_v43 = vld [vmem:[%s1269_s1 + $0x28] sm:$0xff]  ;;  %v209_v47 = vld [vmem:[%s1269_s1 + $0x20] sm:$0xff] }
  0x1b   : > { %767 = vmatpush3.msra.mxu1 %v214_v27  ;;  %730 = vmatprep.subr.mxu0 %v663_v28  ;;  %v658_v48 = vld [vmem:[%s1269_s1 + $0x198] sm:$0xff]  ;;  %v657_v52 = vld [vmem:[%s1269_s1 + $0x190] sm:$0xff]  ;;  %v656_v56 = vld [vmem:[%s1269_s1 + $0x188] sm:$0xff] }
  0x1c   : > { %768 = vmatprep.subr.mxu1 %v229_v29  ;;  %731 = vmatpush3.msra.mxu0 %v647_v30  ;;  %v224_v49 = vld [vmem:[%s1269_s1 + $0x98] sm:$0xff]  ;;  %v223_v53 = vld [vmem:[%s1269_s1 + $0x90] sm:$0xff]  ;;  %v222_v57 = vld [vmem:[%s1269_s1 + $0x88] sm:$0xff] }
  0x1d   : > { %769 = vmatpush3.msra.mxu1 %v213_v31  ;;  %732 = vmatprep.subr.mxu0 %v662_v32  ;;  %v642_v50 = vld [vmem:[%s1269_s1 + $0x118] sm:$0xff]  ;;  %v641_v54 = vld [vmem:[%s1269_s1 + $0x110] sm:$0xff]  ;;  %v1111_v58 = vld [vmem:[%s1090_s22 + $0x8] sm:$0xff] }
  0x1e   : > { %770 = vmatprep.subr.mxu1 %v228_v33  ;;  %733 = vmatpush3.msra.mxu0 %v646_v34  ;;  %v208_v51 = vld [vmem:[%s1269_s1 + $0x18] sm:$0xff]  ;;  %v207_v55 = vld [vmem:[%s1269_s1 + $0x10] sm:$0xff]  ;;  %v640_v59 = vld [vmem:[%s1269_s1 + $0x108] sm:$0xff]  ;;  %v181_v1 = vrot.slane %v1111_v58, 7 }
  0x1f   : > { %771 = vmatpush3.msra.mxu1 %v212_v35  ;;  %734 = vmatprep.subr.mxu0 %v661_v36  ;;  %v206_v60 = vld [vmem:[%s1269_s1 + $0x8] sm:$0xff]  ;;  %v1120_v61 = vld [vmem:[%s1090_s22] sm:$0xff]  ;;  %vm671_vm1 = vmneg %vm179_vm0 }
  0x20   : > { %772 = vmatprep.subr.mxu1 %v227_v37  ;;  %735 = vmatpush3.msra.mxu0 %v645_v38  ;;  %v655_v62 = vld [vmem:[%s1269_s1 + $0x180] sm:$0xff]  ;;  %v180_v3 = vrot.slane %v1120_v61, 7  ;;  %v706_v4 = vld [vmem:[%s1269_s1 + $0x2f8] sm:$0xff]  ;;  %v705_v6 = vld [vmem:[%s1269_s1 + $0x2f0] sm:$0xff]  ;;  %v196_v38 = vrot.slane %v1111_v58, 1 }
  0x21   : > { %773 = vmatpush3.msra.mxu1 %v211_v39  ;;  %736 = vmatprep.subr.mxu0 %v660_v40  ;;  %v221_v63 = vld [vmem:[%s1269_s1 + $0x80] sm:$0xff]  ;;  %v690_v5 = vld [vmem:[%s1269_s1 + $0x278] sm:$0xff]  ;;  %v689_v7 = vld [vmem:[%s1269_s1 + $0x270] sm:$0xff] }
  0x22   : > { %774 = vmatprep.subr.mxu1 %v226_v41  ;;  %737 = vmatpush3.msra.mxu0 %v644_v42  ;;  %v639_v0 = vld [vmem:[%s1269_s1 + $0x100] sm:$0xff]  ;;  %v704_v8 = vld [vmem:[%s1269_s1 + $0x2e8] sm:$0xff]  ;;  %v702_v12 = vld [vmem:[%s1269_s1 + $0x2d8] sm:$0xff]  ;;  %v193_v41 = vrot.slane %v1120_v61, 1 }
  0x23   : > { %775 = vmatpush3.msra.mxu1 %v210_v43  ;;  %738 = vmatprep.subr.mxu0 %v659_v44  ;;  %v205_v2 = vld [vmem:[%s1269_s1] sm:$0xff]  ;;  %v688_v9 = vld [vmem:[%s1269_s1 + $0x268] sm:$0xff]  ;;  %v686_v13 = vld [vmem:[%s1269_s1 + $0x258] sm:$0xff] }
  0x24   : > { %776 = vmatprep.subr.mxu1 %v225_v45  ;;  %739 = vmatpush3.msra.mxu0 %v643_v46  ;;  %v703_v10 = vld [vmem:[%s1269_s1 + $0x2e0] sm:$0xff]  ;;  %v701_v14 = vld [vmem:[%s1269_s1 + $0x2d0] sm:$0xff]  ;;  %v700_v16 = vld [vmem:[%s1269_s1 + $0x2c8] sm:$0xff] }
  0x25   : > { %777 = vmatpush3.msra.mxu1 %v209_v47  ;;  %740 = vmatprep.subr.mxu0 %v658_v48  ;;  %v687_v11 = vld [vmem:[%s1269_s1 + $0x260] sm:$0xff]  ;;  %v685_v15 = vld [vmem:[%s1269_s1 + $0x250] sm:$0xff]  ;;  %v684_v17 = vld [vmem:[%s1269_s1 + $0x248] sm:$0xff] }
  0x26   : > { %778 = vmatprep.subr.mxu1 %v224_v49  ;;  %741 = vmatpush3.msra.mxu0 %v642_v50  ;;  %v699_v18 = vld [vmem:[%s1269_s1 + $0x2c0] sm:$0xff]  ;;  %v698_v20 = vld [vmem:[%s1269_s1 + $0x2b8] sm:$0xff]  ;;  %v697_v22 = vld [vmem:[%s1269_s1 + $0x2b0] sm:$0xff] }
  0x27   : > { %779 = vmatpush3.msra.mxu1 %v208_v51  ;;  %742 = vmatprep.subr.mxu0 %v657_v52  ;;  %v683_v19 = vld [vmem:[%s1269_s1 + $0x240] sm:$0xff]  ;;  %v682_v21 = vld [vmem:[%s1269_s1 + $0x238] sm:$0xff]  ;;  %v681_v24 = vld [vmem:[%s1269_s1 + $0x230] sm:$0xff] }
  0x28   : > { %780 = vmatprep.subr.mxu1 %v223_v53  ;;  %743 = vmatpush3.msra.mxu0 %v641_v54  ;;  %v1201_v23 = vld [vmem:[%s1090_s22 + $0x18] sm:$0xff]  ;;  %v696_v25 = vld [vmem:[%s1269_s1 + $0x2a8] sm:$0xff]  ;;  %v173_v26 = vld [vmem:[%s1090_s22 + $0x10] sm:$0xff] }
  0x29   : > { %781 = vmatpush3.msra.mxu1 %v207_v55  ;;  %744 = vmatprep.subr.mxu0 %v656_v56  ;;  %v680_v27 = vld [vmem:[%s1269_s1 + $0x228] sm:$0xff]  ;;  %v184_v28 = vrot.slane %v1201_v23, 7  ;;  %v695_v29 = vld [vmem:[%s1269_s1 + $0x2a0] sm:$0xff]  ;;  %v182_v31 = vrot.slane %v173_v26, 7  ;;  %v694_v32 = vld [vmem:[%s1269_s1 + $0x298] sm:$0xff]  ;;  %v197_v39 = vrot.slane %v1201_v23, 1 }
  0x2a   : > { %782 = vmatprep.subr.mxu1 %v222_v57  ;;  %745 = vmatpush3.msra.mxu0 %v640_v59  ;;  %v679_v30 = vld [vmem:[%s1269_s1 + $0x220] sm:$0xff]  ;;  %v678_v34 = vld [vmem:[%s1269_s1 + $0x218] sm:$0xff]  ;;  %v693_v36 = vld [vmem:[%s1269_s1 + $0x290] sm:$0xff]  ;;  %v194_v42 = vrot.slane %v173_v26, 1 }
  0x2b   : > { %783 = vmatpush3.msra.mxu1 %v206_v60  ;;  %746 = vmatprep.subr.mxu0 %v655_v62  ;;  %v185_v33 = vsel %vm179_vm0, %v181_v1, %v184_v28  ;;  %v183_v35 = vsel %vm179_vm0, %v180_v3, %v182_v31  ;;  %v677_v37 = vld [vmem:[%s1269_s1 + $0x210] sm:$0xff]  ;;  %v692_v40 = vld [vmem:[%s1269_s1 + $0x288] sm:$0xff]  ;;  %v691_v44 = vld [vmem:[%s1269_s1 + $0x280] sm:$0xff]  ;;  %v198_v46 = vsel %vm192_vm2, %v196_v38, %v197_v39 }
  0x2c   : > { %784 = vmatprep.subr.mxu1 %v221_v63  ;;  %747 = vmatpush3.msra.mxu0 %v639_v0  ;;  %v676_v43 = vld [vmem:[%s1269_s1 + $0x208] sm:$0xff]  ;;  %v675_v45 = vld [vmem:[%s1269_s1 + $0x200] sm:$0xff]  ;;  %v195_v47 = vsel %vm192_vm2, %v193_v41, %v194_v42 }
  0x2d   : > { %334 = vmatprep.mubr.f32.mxu0 %v1111_v58  ;;  %785 = vmatpush3.msra.mxu1 %v205_v2 }
  0x2e   : > { %672 = vmatprep.mubr.msk.f32.mxu1 %vm671_vm1, %v181_v1  ;;  %335 = vmatmul.mubr.f32.vlgmr.msra.gmra.mxu0 %v1120_v61 }
  0x2f   : > { %674 = vmatmul.mubr.msk.f32.vlgmr.msra.gmra.mxu1 %vm671_vm1, %v180_v3  ;;  %792 = vmatprep.subr.mxu0 %v706_v4 }
  0x30   : > { %830 = vmatprep.subr.mxu1 %v706_v4  ;;  %793 = vmatpush3.msra.mxu0 %v690_v5  ;;  %v709_v4 = vld [vmem:[%s1270_s2] ss:$0 sm:$0xff] }
  0x31   : > { %846 = vmatpush3.msra.mxu1 %v690_v5  ;;  %794 = vmatprep.subr.mxu0 %v705_v6 }
  0x32   : > { %831 = vmatprep.subr.mxu1 %v705_v6  ;;  %795 = vmatpush3.msra.mxu0 %v689_v7 }
  0x33   : > { %847 = vmatpush3.msra.mxu1 %v689_v7  ;;  %796 = vmatprep.subr.mxu0 %v704_v8 }
  0x34   : > { %832 = vmatprep.subr.mxu1 %v704_v8  ;;  %797 = vmatpush3.msra.mxu0 %v688_v9 }
  0x35   : > { %848 = vmatpush3.msra.mxu1 %v688_v9  ;;  %798 = vmatprep.subr.mxu0 %v703_v10 }
  0x36   : > { %833 = vmatprep.subr.mxu1 %v703_v10  ;;  %799 = vmatpush3.msra.mxu0 %v687_v11 }
  0x37   : > { %849 = vmatpush3.msra.mxu1 %v687_v11  ;;  %800 = vmatprep.subr.mxu0 %v702_v12 }
  0x38   : > { %834 = vmatprep.subr.mxu1 %v702_v12  ;;  %801 = vmatpush3.msra.mxu0 %v686_v13 }
  0x39   : > { %850 = vmatpush3.msra.mxu1 %v686_v13  ;;  %802 = vmatprep.subr.mxu0 %v701_v14 }
  0x3a   : > { %835 = vmatprep.subr.mxu1 %v701_v14  ;;  %803 = vmatpush3.msra.mxu0 %v685_v15 }
  0x3b   : > { %851 = vmatpush3.msra.mxu1 %v685_v15  ;;  %804 = vmatprep.subr.mxu0 %v700_v16 }
  0x3c   : > { %836 = vmatprep.subr.mxu1 %v700_v16  ;;  %805 = vmatpush3.msra.mxu0 %v684_v17 }
  0x3d   : > { %852 = vmatpush3.msra.mxu1 %v684_v17  ;;  %806 = vmatprep.subr.mxu0 %v699_v18 }
  0x3e   : > { %837 = vmatprep.subr.mxu1 %v699_v18  ;;  %807 = vmatpush3.msra.mxu0 %v683_v19 }
  0x3f   : > { %853 = vmatpush3.msra.mxu1 %v683_v19  ;;  %808 = vmatprep.subr.mxu0 %v698_v20 }
  0x40   : > { %838 = vmatprep.subr.mxu1 %v698_v20  ;;  %809 = vmatpush3.msra.mxu0 %v682_v21 }
  0x41   : > { %854 = vmatpush3.msra.mxu1 %v682_v21  ;;  %810 = vmatprep.subr.mxu0 %v697_v22 }
  0x42   : > { %839 = vmatprep.subr.mxu1 %v697_v22  ;;  %811 = vmatpush3.msra.mxu0 %v681_v24 }
  0x43   : > { %855 = vmatpush3.msra.mxu1 %v681_v24  ;;  %812 = vmatprep.subr.mxu0 %v696_v25 }
  0x44   : > { %840 = vmatprep.subr.mxu1 %v696_v25  ;;  %813 = vmatpush3.msra.mxu0 %v680_v27 }
  0x45   : > { %856 = vmatpush3.msra.mxu1 %v680_v27  ;;  %814 = vmatprep.subr.mxu0 %v695_v29 }
  0x46   : > { %841 = vmatprep.subr.mxu1 %v695_v29  ;;  %815 = vmatpush3.msra.mxu0 %v679_v30 }
  0x47   : > { %857 = vmatpush3.msra.mxu1 %v679_v30  ;;  %816 = vmatprep.subr.mxu0 %v694_v32 }
  0x48   : > { %842 = vmatprep.subr.mxu1 %v694_v32  ;;  %339 = vmatprep.mubr.f32.mxu0 %v1201_v23 }
  0x49   : > { %414 = vmatprep.mubr.f32.mxu1 %v185_v33  ;;  %817 = vmatpush3.msra.mxu0 %v678_v34 }
  0x4a   : > { %858 = vmatpush3.msra.mxu1 %v678_v34  ;;  %340 = vmatmul.mubr.f32.gmra.mxu0 %v173_v26 }
  0x4b   : > { %415 = vmatmul.mubr.f32.gmra.mxu1 %v183_v35  ;;  %818 = vmatprep.subr.mxu0 %v693_v36 }
  0x4c   : > { %843 = vmatprep.subr.mxu1 %v693_v36  ;;  %819 = vmatpush3.msra.mxu0 %v677_v37 }
  0x4d   : > { %859 = vmatpush3.msra.mxu1 %v677_v37  ;;  %820 = vmatprep.subr.mxu0 %v692_v40 }
  0x4e   : > { %844 = vmatprep.subr.mxu1 %v692_v40  ;;  %821 = vmatpush3.msra.mxu0 %v676_v43 }
  0x4f   : > { %860 = vmatpush3.msra.mxu1 %v676_v43  ;;  %822 = vmatprep.subr.mxu0 %v691_v44 }
  0x50   : > { %845 = vmatprep.subr.mxu1 %v691_v44  ;;  %823 = vmatpush3.msra.mxu0 %v675_v45 }
  0x51   : > { %861 = vmatpush3.msra.mxu1 %v675_v45  ;;  %517 = vmatprep.mubr.f32.mxu0 %v198_v46 }
  0x52   : > { %707 = vmatprep.mubr.msk.f32.mxu1 %vm192_vm2, %v197_v39  ;;  %518 = vmatmul.mubr.f32.vlgmr.msra.gmra.mxu0 %v195_v47 }
  0x53   : > { %708 = vmatmul.mubr.msk.f32.vlgmr.msra.gmra.mxu1 %vm192_vm2, %v194_v42 }
  0xee   : > { %v748_v48 = vpop.f32.mrf.mxu0 }
  0xef   : > { %v786_v49 = vpop.f32.mrf.mxu1 }
  0xf0   : > { %v749_v50 = vpop.f32.mrf.mxu0 }
  0xf1   : > { %v787_v51 = vpop.f32.mrf.mxu1  ;;  %v750_v56 = vadd.f32 %v749_v50, %v748_v48 }
  0xf2   : > { %v788_v57 = vadd.f32 %v787_v51, %v786_v49 }
  0xf4   : > { %v412_v0 = vadd.f32 %v788_v57, %v750_v56 }
 0x10a   : > { %v751_v52 = vpop.f32.mrf.mxu0 }
 0x10b   : > { %v789_v53 = vpop.f32.mrf.mxu1 }
 0x10c   : > { %v752_v54 = vpop.f32.mrf.mxu0 }
 0x10d   : > { %v790_v55 = vpop.f32.mrf.mxu1  ;;  %v753_v58 = vadd.f32 %v752_v54, %v751_v52 }
 0x10e   : > { %v791_v59 = vadd.f32 %v790_v55, %v789_v53 }
 0x110   : > { %v417_v1 = vadd.f32 %v791_v59, %v753_v58 }
 0x112   : > { %v824_v60 = vpop.f32.mrf.mxu0 }
 0x113   : > { %v827_v61 = vpop.f32.mrf.mxu1 }
 0x114   : > { %v825_v62 = vpop.f32.mrf.mxu0 }
 0x115   : > { %v828_v63 = vpop.f32.mrf.mxu1  ;;  %v826_v2 = vadd.f32 %v825_v62, %v824_v60 }
 0x116   : > { %v829_v3 = vadd.f32 %v828_v63, %v827_v61 }
 0x117   : > { %v528_v5 = vadd.f32 %v826_v2, %v412_v0 }
 0x118   : > { %v529_v6 = vadd.f32 %v829_v3, %v417_v1 }
 0x119   : > { %v537_v7 = vadd.f32 %v709_v4, %v528_v5 }
 0x11a   : > { %v538_v8 = vadd.f32 %v709_v4, %v529_v6 }
 0x11b   : > { %v541_v9 = vmin.f32 %v537_v7, 0.0  ;;  %v539_v15 = vmax.f32 %v537_v7, 0.0 }
 0x11c   : > { %v542_v10 = vmin.f32 %v538_v8, 0.0  ;;  %v540_v19 = vmax.f32 %v538_v8, 0.0 }
 0x11d   : > { %v543_v11 = vmul.f32 1.442695, %v541_v9 }
 0x11e   : > { %v545_v12 = vmul.f32 1.442695, %v542_v10 }
 0x11f   : > { %870 = vpow2.f32 %v543_v11 }
 0x120   : > { %872 = vpow2.f32 %v545_v12 }
 0x12c   : > { %v871_v13 = vpop.eup %870 }
 0x12d   : > { %v873_v14 = vpop.eup %872  ;;  %v710_v16 = vadd.f32 -1.0, %v871_v13 }
 0x12e   : > { %v711_v18 = vadd.f32 -1.0, %v873_v14 }
 0x12f   : > { %v549_v17 = vadd.f32 %v710_v16, %v539_v15 }
 0x130   : > { %v550_v20 = vadd.f32 %v711_v18, %v540_v19 }
 0x131   : > { %551 = vmax.xlane.f32.xlu0 %v549_v17 }
 0x135   : > { %553 = vmax.xlane.f32.xlu0 %v550_v20 }
 0x1ba   : > { %v552_v21 = vpop.xlane.xlu0 %551 }
 0x1bb   : > { %v555_v22 = vsub.f32 %v549_v17, %v552_v21 }
 0x1bd   : > { %v557_v23 = vmul.f32 1.442695, %v555_v22 }
 0x1be   : > { %v554_v24 = vpop.xlane.xlu0 %553 }
 0x1bf   : > { %874 = vpow2.f32 %v557_v23  ;;  %v556_v25 = vsub.f32 %v550_v20, %v554_v24 }
 0x1c1   : > { %v559_v26 = vmul.f32 1.442695, %v556_v25 }
 0x1c3   : > { %876 = vpow2.f32 %v559_v26 }
 0x1cc   : > { %v875_v27 = vpop.eup %874 }
 0x1cd   : > { %561 = vadd.xlane.f32.xlu1 %v875_v27 }
 0x1d0   : > { %v877_v28 = vpop.eup %876 }
 0x1d1   : > { %563 = vadd.xlane.f32.xlu1 %v877_v28 }
 0x256   : > { %v562_v29 = vpop.xlane.xlu1 %561 }
 0x257   : > { %878 = vlog2.f32 %v562_v29 }
 0x25a   : > { %v564_v30 = vpop.xlane.xlu1 %563 }
 0x25b   : > { %880 = vlog2.f32 %v564_v30 }
 0x264   : > { %v879_v31 = vpop.eup %878 }
 0x265   : > { %v566_v32 = vmul.f32 0.6931472, %v879_v31 }
 0x267   : > { %v569_v33 = vadd.f32 %v566_v32, %v552_v21 }
 0x268   : > { %v881_v34 = vpop.eup %880 }
 0x269   : > { %v571_v35 = vsub.f32 %v549_v17, %v569_v33  ;;  %v568_v36 = vmul.f32 0.6931472, %v881_v34 }
 0x26b   : > { %573 = vst [vmem:[%s170_s18] sm:$0xff] %v571_v35  ;;  %v570_v37 = vadd.f32 %v568_v36, %v554_v24 }
 0x26d   : > { %v572_v38 = vsub.f32 %v550_v20, %v570_v37 }
 0x26f   : > { %574 = vst [vmem:[%s170_s18 + $0x8] sm:$0xff] %v572_v38 }
 0x270 PF: > { %s13_s12 = sadd.s32 1, %s888_s12  }
 0x271   : > { %p10_p4 = scmp.ge.s32.totalorder %s13_s12, 4  }
 0x273   :  { %12 = sbr.rel (!%p10_p4) target bundleno = 1 (0x1), region = 64 }

</bundles_post_ra>
